<compile_context>
chip_gen: v6e
topology: v6e:2x2x1
jax: 0.10.0
libtpu: 0.0.40
codegen_flags: <defaults>
</compile_context>

<pallas_src>
import jax
import jax.numpy as jnp
from jax.experimental import pallas as pl
from jax.experimental.pallas import tpu as pltpu

# True layer widths 400 / 300 / 1, lane-padded to 512 / 384 (output handled as
# a reduction, so no 128-wide output padding anymore).
_H1, _H1P = 400, 512
_H2, _H2P = 300, 384


def _round_up(x, m):
    return ((x + m - 1) // m) * m


def _critic_kernel(x_ref, w1_ref, b1_ref, w2h_ref, w2a_ref, b2_ref,
                   w3_ref, b3_ref, out_ref):
    x = x_ref[...]                                              # (TB, IN_P) bf16

    # Layer 1: h1 = relu(obs @ W1 + b1)   (x@W1 == obs@W1: zero rows under act)
    h1 = jnp.dot(x, w1_ref[...],
                 preferred_element_type=jnp.float32) + b1_ref[...]
    h1 = jnp.maximum(h1, 0.0)                                   # (TB, 512) f32

    # Layer 2: relu(cat([h1, act], 1) @ W2 + b2) == relu(h1@W2h + x@W2a + b2)
    # (W2a has zero rows under the obs lanes, so x@W2a == actions@W2a).
    h2 = (jnp.dot(h1.astype(jnp.bfloat16), w2h_ref[...],
                  preferred_element_type=jnp.float32)
          + jnp.dot(x, w2a_ref[...], preferred_element_type=jnp.float32)
          + b2_ref[...])
    h2 = jnp.maximum(h2, 0.0)                                   # (TB, 384) f32

    # Layer 3: q = h2 @ w3 + b3, done as VPU mul + XLU lane reduce (w3 is a
    # (1, 384) row; padded lanes are zero).  Output is (TB, 1) f32.
    out_ref[...] = (jnp.sum(h2 * w3_ref[...], axis=1, keepdims=True)
                    + b3_ref[...])


def _combine_inputs(obs, actions, rows, in_p, dtype):
    """Merge obs/actions into one lane-dense (rows, in_p) block: obs in lanes
    [0, obs_dim), actions next, zeros elsewhere; optional zero rows at the end."""
    x = jnp.concatenate([obs, actions], axis=1)
    b, d = x.shape
    x = jnp.pad(x, ((0, rows - b), (0, in_p - d)))
    return x.astype(dtype)


def _choose_tiling(B):
    """Returns (TB, padded_rows).  Small B: one 8-aligned tile.  Large B: an
    even number (>=2) of <=1024-row tiles (multiple of 128), ragged last tile
    masked by Pallas (no batch padding)."""
    if B < 256:
        tb = _round_up(B, 8)
        return tb, tb
    n_pairs = pl.cdiv(B, 2 * 1024)
    tb = min(1024, _round_up(pl.cdiv(B, 2 * n_pairs), 128))
    return tb, B


@jax.jit
def ddpg_critic_forward(obs, actions, params):
    """obs: (B, obs_dim) f32, actions: (B, act_dim) f32 -> (B, 1) f32."""
    w1, b1, w2h, w2a, b2, w3, b3 = params
    B = obs.shape[0]
    in_p = w1.shape[0]

    TB, B_rows = _choose_tiling(B)
    n_tiles = pl.cdiv(B_rows, TB)

    x = _combine_inputs(obs, actions, B_rows, in_p, jnp.bfloat16)

    flops = 2 * B_rows * (in_p * _H1P + _H1P * _H2P + in_p * _H2P + _H2P)
    bytes_accessed = (
        2 * B_rows * in_p + 4 * B_rows                     # bf16 input, f32 out
        + 2 * (w1.size + w2h.size + w2a.size)              # bf16 weights
        + 4 * (b1.size + b2.size + w3.size + b3.size))     # f32 biases / w3 row

    def const_spec(a):
        return pl.BlockSpec(a.shape, lambda i: (0, 0))

    out = pl.pallas_call(
        _critic_kernel,
        out_shape=jax.ShapeDtypeStruct((B_rows, 1), jnp.float32),
        grid=(n_tiles,),
        in_specs=[
            pl.BlockSpec((TB, in_p), lambda i: (i, 0)),
            const_spec(w1), const_spec(b1),
            const_spec(w2h), const_spec(w2a), const_spec(b2),
            const_spec(w3), const_spec(b3),
        ],
        out_specs=pl.BlockSpec((TB, 1), lambda i: (i, 0)),
        compiler_params=pltpu.CompilerParams(
            dimension_semantics=("parallel",)),
        cost_estimate=pl.CostEstimate(
            flops=flops, transcendentals=0, bytes_accessed=bytes_accessed),
    )(x, w1, b1, w2h, w2a, b2, w3, b3)

    return out[:B]


def init_params(key, obs_dim, action_dim):
    """nn.Linear-style init (U(-1/sqrt(fan_in), +)), stored transposed,
    zero-padded to lane-multiple widths and laid out for the merged input.
    Returns (kernel_params_bf16, f32_params)."""
    def linear(key, fan_in, fan_out):
        kw, kb = jax.random.split(key)
        bound = 1.0 / jnp.sqrt(jnp.float32(fan_in))
        w = jax.random.uniform(kw, (fan_in, fan_out), jnp.float32, -bound, bound)
        b = jax.random.uniform(kb, (1, fan_out), jnp.float32, -bound, bound)
        return w, b

    in_dim = obs_dim + action_dim
    in_p = _round_up(in_dim, 128)

    k1, k2, k3 = jax.random.split(key, 3)
    w1, b1 = linear(k1, obs_dim, _H1)                 # (obs_dim, 400), (1, 400)
    w2, b2 = linear(k2, _H1 + action_dim, _H2)        # (400+act, 300), (1, 300)
    w3, b3 = linear(k3, _H2, 1)                       # (300, 1),       (1, 1)

    # Split linear2's weight: cat([h1, act], 1) @ W2 == h1 @ W2h + act @ W2a.
    w2h, w2a = w2[:_H1], w2[_H1:]

    # Merged-input / lane-padded layouts.  Padding rows/cols are exactly zero
    # and relu(0) = 0, so the math matches the unpadded module.
    w1_f = jnp.zeros((in_p, _H1P), jnp.float32).at[:obs_dim, :_H1].set(w1)
    w2a_f = jnp.zeros((in_p, _H2P), jnp.float32).at[obs_dim:in_dim, :_H2].set(w2a)
    w2h_f = jnp.zeros((_H1P, _H2P), jnp.float32).at[:_H1, :_H2].set(w2h)
    b1_f = jnp.zeros((1, _H1P), jnp.float32).at[:, :_H1].set(b1)
    b2_f = jnp.zeros((1, _H2P), jnp.float32).at[:, :_H2].set(b2)
    w3_f = jnp.zeros((1, _H2P), jnp.float32).at[:, :_H2].set(w3[:, 0])
    b3_f = b3                                                           # (1, 1)

    f32_params = (w1_f, b1_f, w2h_f, w2a_f, b2_f, w3_f, b3_f)
    kernel_params = (w1_f.astype(jnp.bfloat16), b1_f,
                     w2h_f.astype(jnp.bfloat16), w2a_f.astype(jnp.bfloat16),
                     b2_f, w3_f, b3_f)
    return kernel_params, f32_params


def reference_forward(obs, actions, params, operand_dtype):
    """Pure-JAX reference with the same weight layout.  operand_dtype=bf16
    mirrors the kernel's math exactly; operand_dtype=f32 (with the f32 params)
    mirrors the original PyTorch module."""
    w1, b1, w2h, w2a, b2, w3, b3 = params
    x = _combine_inputs(obs, actions, obs.shape[0], w1.shape[0], operand_dtype)
    h1 = jnp.maximum(
        jnp.dot(x, w1, preferred_element_type=jnp.float32) + b1, 0.0)
    h2 = jnp.maximum(
        jnp.dot(h1.astype(operand_dtype), w2h, preferred_element_type=jnp.float32)
        + jnp.dot(x, w2a, preferred_element_type=jnp.float32) + b2, 0.0)
    return jnp.sum(h2 * w3, axis=1, keepdims=True) + b3


if __name__ == "__main__":
    obs_dim, action_dim, batch = 32, 8, 2

    key = jax.random.PRNGKey(0)
    kp, ko, ka = jax.random.split(key, 3)

    kernel_params, f32_params = init_params(kp, obs_dim, action_dim)
    obs = jax.random.normal(ko, (batch, obs_dim), jnp.float32)
    actions = jax.random.normal(ka, (batch, action_dim), jnp.float32)

    q = ddpg_critic_forward(obs, actions, kernel_params)
    q = jax.block_until_ready(q)
    assert q.shape == (batch, 1)

    # Kernel vs identical-math (bf16-operand, f32-accumulate) JAX reference.
    q_bf16 = reference_forward(obs, actions, kernel_params, jnp.bfloat16)
    assert jnp.allclose(q, q_bf16, atol=2e-3, rtol=2e-3), (q, q_bf16)

    # Kernel vs the f32 module semantics (loosened: bf16 rounding ~1e-2 rel).
    q_f32 = reference_forward(obs, actions, f32_params, jnp.float32)
    assert jnp.allclose(q, q_f32, atol=3e-2, rtol=3e-2), (q, q_f32)

    print("KERNEL_OK")
</pallas_src>

<mosaic_0001>
module attributes {stable_mosaic.version = 11 : i64} {
  func.func @_critic_kernel(%arg0: i32, %arg1: memref<8x128xbf16, #tpu.memory_space<vmem>>, %arg2: memref<128x512xbf16, #tpu.memory_space<vmem>>, %arg3: memref<1x512xf32, #tpu.memory_space<vmem>>, %arg4: memref<512x384xbf16, #tpu.memory_space<vmem>>, %arg5: memref<128x384xbf16, #tpu.memory_space<vmem>>, %arg6: memref<1x384xf32, #tpu.memory_space<vmem>>, %arg7: memref<1x384xf32, #tpu.memory_space<vmem>>, %arg8: memref<1x1xf32, #tpu.memory_space<vmem>>, %arg9: memref<8x1xf32, #tpu.memory_space<vmem>>) attributes {dimension_semantics = [#tpu.dimension_semantics<parallel>], iteration_bounds = array<i64: 1>, scalar_prefetch = 0 : i64, scratch_operands = 0 : i64, tpu.core_type = #tpu.core_type<tc>, window_params = [{transform_indices = @transform_0, window_bounds = array<i64: 8, 128>}, {pipeline_mode = #tpu.pipeline_mode<synchronous>, transform_indices = @transform_1, window_bounds = array<i64: 128, 512>}, {pipeline_mode = #tpu.pipeline_mode<synchronous>, transform_indices = @transform_2, window_bounds = array<i64: 1, 512>}, {pipeline_mode = #tpu.pipeline_mode<synchronous>, transform_indices = @transform_3, window_bounds = array<i64: 512, 384>}, {pipeline_mode = #tpu.pipeline_mode<synchronous>, transform_indices = @transform_4, window_bounds = array<i64: 128, 384>}, {pipeline_mode = #tpu.pipeline_mode<synchronous>, transform_indices = @transform_5, window_bounds = array<i64: 1, 384>}, {pipeline_mode = #tpu.pipeline_mode<synchronous>, transform_indices = @transform_6, window_bounds = array<i64: 1, 384>}, {pipeline_mode = #tpu.pipeline_mode<synchronous>, transform_indices = @transform_7, window_bounds = array<i64: 1, 1>}, {transform_indices = @transform_8, window_bounds = array<i64: 8, 1>}]} {
    %c0 = arith.constant 0 : index
    %c0_0 = arith.constant 0 : index
    %0 = vector.load %arg1[%c0, %c0_0] : memref<8x128xbf16, #tpu.memory_space<vmem>>, vector<8x128xbf16>
    %c0_1 = arith.constant 0 : index
    %c0_2 = arith.constant 0 : index
    %1 = vector.load %arg2[%c0_1, %c0_2] : memref<128x512xbf16, #tpu.memory_space<vmem>>, vector<128x512xbf16>
    %cst = arith.constant dense<0.000000e+00> : vector<8x512xf32>
    %2 = tpu.matmul %0, %1, %cst {dimension_numbers = #tpu.dot_dimension_numbers<[1], [0], [0], [1], [0, 0, 1, 1], [], []>} : vector<8x128xbf16>, vector<128x512xbf16>, vector<8x512xf32> -> vector<8x512xf32>
    %c0_3 = arith.constant 0 : index
    %c0_4 = arith.constant 0 : index
    %3 = vector.load %arg3[%c0_3, %c0_4] : memref<1x512xf32, #tpu.memory_space<vmem>>, vector<1x512xf32>
    %4 = vector.broadcast %3 : vector<1x512xf32> to vector<8x512xf32>
    %5 = arith.addf %2, %4 : vector<8x512xf32>
    %cst_5 = arith.constant 0.000000e+00 : f32
    %6 = vector.broadcast %cst_5 : f32 to vector<8x512xf32>
    %7 = arith.maximumf %5, %6 : vector<8x512xf32>
    %8 = arith.truncf %7 : vector<8x512xf32> to vector<8x512xbf16>
    %c0_6 = arith.constant 0 : index
    %c0_7 = arith.constant 0 : index
    %9 = vector.load %arg4[%c0_6, %c0_7] : memref<512x384xbf16, #tpu.memory_space<vmem>>, vector<512x384xbf16>
    %cst_8 = arith.constant dense<0.000000e+00> : vector<8x384xf32>
    %10 = tpu.matmul %8, %9, %cst_8 {dimension_numbers = #tpu.dot_dimension_numbers<[1], [0], [0], [1], [0, 0, 1, 1], [], []>} : vector<8x512xbf16>, vector<512x384xbf16>, vector<8x384xf32> -> vector<8x384xf32>
    %c0_9 = arith.constant 0 : index
    %c0_10 = arith.constant 0 : index
    %11 = vector.load %arg5[%c0_9, %c0_10] : memref<128x384xbf16, #tpu.memory_space<vmem>>, vector<128x384xbf16>
    %cst_11 = arith.constant dense<0.000000e+00> : vector<8x384xf32>
    %12 = tpu.matmul %0, %11, %cst_11 {dimension_numbers = #tpu.dot_dimension_numbers<[1], [0], [0], [1], [0, 0, 1, 1], [], []>} : vector<8x128xbf16>, vector<128x384xbf16>, vector<8x384xf32> -> vector<8x384xf32>
    %13 = arith.addf %10, %12 : vector<8x384xf32>
    %c0_12 = arith.constant 0 : index
    %c0_13 = arith.constant 0 : index
    %14 = vector.load %arg6[%c0_12, %c0_13] : memref<1x384xf32, #tpu.memory_space<vmem>>, vector<1x384xf32>
    %15 = vector.broadcast %14 : vector<1x384xf32> to vector<8x384xf32>
    %16 = arith.addf %13, %15 : vector<8x384xf32>
    %cst_14 = arith.constant 0.000000e+00 : f32
    %17 = vector.broadcast %cst_14 : f32 to vector<8x384xf32>
    %18 = arith.maximumf %16, %17 : vector<8x384xf32>
    %c0_15 = arith.constant 0 : index
    %c0_16 = arith.constant 0 : index
    %19 = vector.load %arg7[%c0_15, %c0_16] : memref<1x384xf32, #tpu.memory_space<vmem>>, vector<1x384xf32>
    %20 = vector.broadcast %19 : vector<1x384xf32> to vector<8x384xf32>
    %21 = arith.mulf %18, %20 : vector<8x384xf32>
    %cst_17 = arith.constant dense<0.000000e+00> : vector<8xf32>
    %22 = vector.multi_reduction <add>, %21, %cst_17 [1] : vector<8x384xf32> to vector<8xf32>
    %23 = vector.shape_cast %22 : vector<8xf32> to vector<8x1xf32>
    %c0_18 = arith.constant 0 : index
    %c0_19 = arith.constant 0 : index
    %24 = vector.load %arg8[%c0_18, %c0_19] : memref<1x1xf32, #tpu.memory_space<vmem>>, vector<1x1xf32>
    %25 = vector.broadcast %24 : vector<1x1xf32> to vector<8x1xf32>
    %26 = arith.addf %23, %25 : vector<8x1xf32>
    %c0_20 = arith.constant 0 : index
    %c0_21 = arith.constant 0 : index
    %27 = vector.load %arg9[%c0_20, %c0_21] : memref<8x1xf32, #tpu.memory_space<vmem>>, vector<8x1xf32>
    tpu.vector_store %arg9[%c0_20, %c0_21], %26 {strides = array<i32>} : memref<8x1xf32, #tpu.memory_space<vmem>>, vector<8x1xf32>,
    return
  }
  func.func @transform_0(%arg0: i32) -> (i32, i32) {
    %c0_i32 = arith.constant 0 : i32
    %c0_i32_0 = arith.constant 0 : i32
    return %arg0, %c0_i32 : i32, i32
  }
  func.func @transform_1(%arg0: i32) -> (i32, i32) {
    %c0_i32 = arith.constant 0 : i32
    %c0_i32_0 = arith.constant 0 : i32
    %c0_i32_1 = arith.constant 0 : i32
    return %c0_i32, %c0_i32_0 : i32, i32
  }
  func.func @transform_2(%arg0: i32) -> (i32, i32) {
    %c0_i32 = arith.constant 0 : i32
    %c0_i32_0 = arith.constant 0 : i32
    %c0_i32_1 = arith.constant 0 : i32
    return %c0_i32, %c0_i32_0 : i32, i32
  }
  func.func @transform_3(%arg0: i32) -> (i32, i32) {
    %c0_i32 = arith.constant 0 : i32
    %c0_i32_0 = arith.constant 0 : i32
    %c0_i32_1 = arith.constant 0 : i32
    return %c0_i32, %c0_i32_0 : i32, i32
  }
  func.func @transform_4(%arg0: i32) -> (i32, i32) {
    %c0_i32 = arith.constant 0 : i32
    %c0_i32_0 = arith.constant 0 : i32
    %c0_i32_1 = arith.constant 0 : i32
    return %c0_i32, %c0_i32_0 : i32, i32
  }
  func.func @transform_5(%arg0: i32) -> (i32, i32) {
    %c0_i32 = arith.constant 0 : i32
    %c0_i32_0 = arith.constant 0 : i32
    %c0_i32_1 = arith.constant 0 : i32
    return %c0_i32, %c0_i32_0 : i32, i32
  }
  func.func @transform_6(%arg0: i32) -> (i32, i32) {
    %c0_i32 = arith.constant 0 : i32
    %c0_i32_0 = arith.constant 0 : i32
    %c0_i32_1 = arith.constant 0 : i32
    return %c0_i32, %c0_i32_0 : i32, i32
  }
  func.func @transform_7(%arg0: i32) -> (i32, i32) {
    %c0_i32 = arith.constant 0 : i32
    %c0_i32_0 = arith.constant 0 : i32
    %c0_i32_1 = arith.constant 0 : i32
    return %c0_i32, %c0_i32_0 : i32, i32
  }
  func.func @transform_8(%arg0: i32) -> (i32, i32) {
    %c0_i32 = arith.constant 0 : i32
    %c0_i32_0 = arith.constant 0 : i32
    return %arg0, %c0_i32 : i32, i32
  }
}

</mosaic_0001>

<bundles_post_ra>
// kernel: ddpg_critic_forward.1
= control target key start
LH: loop header
LB: loop body
LE: loop exit
PB: predicated region body
PF: predicated region fallthrough
CT: control target
= control target key end

     0   :  { %s2106_s0 = inlined_call_operand.vmem [shape: bf16[8,128], index: 0, kind: input, shape index: {}]   ;;  %s2107_s1 = inlined_call_operand.hbm [shape: bf16[128,512], index: 1, kind: input, shape index: {}]   ;;  %s2108_s2 = inlined_call_operand.vmem [shape: f32[1,512], index: 2, kind: input, shape index: {}]   ;;  %s2109_s3 = inlined_call_operand.hbm [shape: bf16[512,384], index: 3, kind: input, shape index: {}]   ;;  %s2110_s4 = inlined_call_operand.hbm [shape: bf16[128,384], index: 4, kind: input, shape index: {}]   ;;  %s2111_s5 = inlined_call_operand.vmem [shape: f32[1,384], index: 5, kind: input, shape index: {}]   ;;  %s2112_s6 = inlined_call_operand.vmem [shape: f32[1,384], index: 6, kind: input, shape index: {}]   ;;  %s2113_s7 = inlined_call_operand.<no memory space> [shape: f32[1,1], index: 7, kind: input, shape index: {}]   ;;  %s2114_s8 = inlined_call_operand.vmem [shape: f32[8,1], index: 8, kind: output, shape index: {}]  }
   0x1   :  { %v13_v0 = vstv %s2113_s7 }
   0x2   :  { %14 = vst [vmem:[#allocation2] sm:$0x1] %v13_v0 }
   0x3   :  { %15 = vsyncpa [#allocation4], 0 }
   0x4   :  { %16 = vsyncpa [#allocation6], 0  ;;  %s1992_s29 = smov [#allocation5]  }
   0x5   :  { %s38_s30 = sshll.u32 %s1992_s29, 4  ;;  %s39_s30 = int_to_ptr.vmem [resolvable:$true] %s38_s30 }
   0x6   :  { %s1936_s9 = scalar_lea.vmem %s39_s30, 12288  ;;  %p1941_p1 = scmp.lt.s32.totalorder %s39_s30, %s39_s30 }
   0x7   :  { %p1937_p0 = scmp.ne.s32.totalorder %s39_s30, %s1936_s9  ;;  %p1942_p2 = scmp.lt.s32.totalorder %s1936_s9, %s1936_s9 }
   0x9   :  { %p1943_p3 = por %p1942_p2, %p1941_p1 }
   0xb   :  { %p1944_p4 = pnand %p1943_p3, %p1937_p0 }
   0xd   :  { %1947 = shalt.err (!%p1944_p4)
}
   0xe   :  { %s1993_s10 = smov 192   ;;  %s1994_s11 = smov 12  }
   0xf   :  { %44 = dma.hbm_to_vmem [thread:$0]  %s2109_s3, 12288, %s39_s30, [#allocation6], %s1993_s10, %s1993_s10, %s1994_s11  }
  0x10   :  { %s1995_s7 = smov [#allocation3]  }
  0x11   :  { %s24_s14 = sshll.u32 %s1995_s7, 4  ;;  %s25_s14 = int_to_ptr.vmem [resolvable:$true] %s24_s14 }
  0x12   :  { %s1956_s15 = scalar_lea.vmem %s25_s14, 4096  ;;  %p1961_p6 = scmp.lt.s32.totalorder %s25_s14, %s25_s14 }
  0x13   :  { %p1957_p5 = scmp.ne.s32.totalorder %s25_s14, %s1956_s15  ;;  %p1962_p7 = scmp.lt.s32.totalorder %s1956_s15, %s1956_s15 }
  0x15   :  { %p1963_p8 = por %p1962_p7, %p1961_p6 }
  0x17   :  { %p1964_p9 = pnand %p1963_p8, %p1957_p5 }
  0x19   :  { %1967 = shalt.err (!%p1964_p9)
}
  0x1a   :  { %s1996_s16 = smov 256   ;;  %s1997_s17 = smov 16  }
  0x1b   :  { %30 = dma.hbm_to_vmem [thread:$0]  %s2107_s1, 4096, %s25_s14, [#allocation4], %s1996_s16, %s1996_s16, %s1997_s17  }
  0x1c   :  { %s1998_s20 = smov [#allocation7]  }
  0x1d   :  { %s50_s21 = sshll.u32 %s1998_s20, 4  ;;  %s51_s21 = int_to_ptr.vmem [resolvable:$true] %s50_s21 }
  0x1e   :  { %s1976_s3 = scalar_lea.vmem %s51_s21, 3072  ;;  %p1981_p11 = scmp.lt.s32.totalorder %s51_s21, %s51_s21 }
  0x1f   :  { %p1977_p10 = scmp.ne.s32.totalorder %s51_s21, %s1976_s3  ;;  %p1982_p12 = scmp.lt.s32.totalorder %s1976_s3, %s1976_s3 }
  0x21   :  { %p1983_p13 = por %p1982_p12, %p1981_p11 }
  0x23   :  { %p1984_p0 = pnand %p1983_p13, %p1977_p10 }
  0x25   :  { %1987 = shalt.err (!%p1984_p0)
}
  0x26   :  { %56 = dma.hbm_to_vmem [thread:$0]  %s2110_s4, 3072, %s51_s21, [#allocation6], %s1993_s10, %s1993_s10, %s1994_s11  }
  0x27   :  { %1988 = dma.done.wait [#allocation4], 4096  }
  0x28   :  { %1989 = vsyncadd [#allocation4], 4294963200 }
  0x29   :  { %1990 = dma.done.wait [#allocation6], 15360  }
  0x2a   :  { %1991 = vsyncadd [#allocation6], 4294951936  ;;  %v1999_v1 = vmov 0   ;;  %v1720_v2 = vld [vmem:[#allocation3 + $0xe4] ss:$16 sps:$4 sm:$0xff]   ;;  %v2000_v38 = vmov 0.0  }
  0x2b   :  { %320 = vmatprep.mubr.bf16.mxu0 %v1999_v1  ;;  %361 = vmatprep.mubr.bf16.mxu1 %v1999_v1  ;;  %v1722_v3 = vld [vmem:[#allocation3 + $0xec] ss:$16 sps:$4 sm:$0xff]   ;;  %v1724_v4 = vld [vmem:[#allocation3 + $0xe0] ss:$16 sps:$4 sm:$0xff]   ;;  %v1725_v5 = vld [vmem:[#allocation3 + $0xe8] ss:$16 sps:$4 sm:$0xff]  }
  0x2c   :  { %288 = vmatprep.subr.bf16.mxu0 %v1720_v2  ;;  %329 = vmatprep.subr.bf16.mxu1 %v1722_v3  ;;  %v1726_v6 = vld [vmem:[#allocation3 + $0xc4] ss:$16 sps:$4 sm:$0xff]   ;;  %v1728_v7 = vld [vmem:[#allocation3 + $0xcc] ss:$16 sps:$4 sm:$0xff]   ;;  %v1730_v8 = vld [vmem:[#allocation3 + $0xc0] ss:$16 sps:$4 sm:$0xff]  }
  0x2d   :  { %289 = vmatpush1.bf16.msra.mxu0 %v1724_v4  ;;  %330 = vmatpush1.bf16.msra.mxu1 %v1725_v5  ;;  %v1731_v9 = vld [vmem:[#allocation3 + $0xc8] ss:$16 sps:$4 sm:$0xff]   ;;  %v1732_v10 = vld [vmem:[#allocation3 + $0xa4] ss:$16 sps:$4 sm:$0xff]   ;;  %v1734_v11 = vld [vmem:[#allocation3 + $0xac] ss:$16 sps:$4 sm:$0xff]  }
  0x2e   :  { %290 = vmatprep.subr.bf16.mxu0 %v1726_v6  ;;  %331 = vmatprep.subr.bf16.mxu1 %v1728_v7  ;;  %v1736_v12 = vld [vmem:[#allocation3 + $0xa0] ss:$16 sps:$4 sm:$0xff]   ;;  %v1737_v13 = vld [vmem:[#allocation3 + $0xa8] ss:$16 sps:$4 sm:$0xff]   ;;  %v1738_v14 = vld [vmem:[#allocation3 + $0x84] ss:$16 sps:$4 sm:$0xff]  }
  0x2f   :  { %v1740_v15 = vld [vmem:[#allocation3 + $0x8c] ss:$16 sps:$4 sm:$0xff]   ;;  %v1742_v16 = vld [vmem:[#allocation3 + $0x80] ss:$16 sps:$4 sm:$0xff]   ;;  %v1743_v17 = vld [vmem:[#allocation3 + $0x88] ss:$16 sps:$4 sm:$0xff]  }
  0x30   :  { %v1744_v18 = vld [vmem:[#allocation3 + $0x64] ss:$16 sps:$4 sm:$0xff]   ;;  %v1746_v19 = vld [vmem:[#allocation3 + $0x6c] ss:$16 sps:$4 sm:$0xff]   ;;  %v1748_v20 = vld [vmem:[#allocation3 + $0x60] ss:$16 sps:$4 sm:$0xff]  }
  0x31   :  { %291 = vmatpush1.bf16.msra.mxu0 %v1730_v8  ;;  %332 = vmatpush1.bf16.msra.mxu1 %v1731_v9  ;;  %v1749_v21 = vld [vmem:[#allocation3 + $0x68] ss:$16 sps:$4 sm:$0xff]   ;;  %v1750_v22 = vld [vmem:[#allocation3 + $0x44] ss:$16 sps:$4 sm:$0xff]   ;;  %v1752_v23 = vld [vmem:[#allocation3 + $0x4c] ss:$16 sps:$4 sm:$0xff]  }
  0x32   :  { %292 = vmatprep.subr.bf16.mxu0 %v1732_v10  ;;  %333 = vmatprep.subr.bf16.mxu1 %v1734_v11  ;;  %v1754_v24 = vld [vmem:[#allocation3 + $0x40] ss:$16 sps:$4 sm:$0xff]   ;;  %v1755_v25 = vld [vmem:[#allocation3 + $0x48] ss:$16 sps:$4 sm:$0xff]   ;;  %v1756_v26 = vld [vmem:[#allocation3 + $0x24] ss:$16 sps:$4 sm:$0xff]  }
  0x33   :  { %v1758_v27 = vld [vmem:[#allocation3 + $0x2c] ss:$16 sps:$4 sm:$0xff]   ;;  %v1760_v28 = vld [vmem:[#allocation3 + $0x20] ss:$16 sps:$4 sm:$0xff]   ;;  %v1761_v29 = vld [vmem:[#allocation3 + $0x28] ss:$16 sps:$4 sm:$0xff]  }
  0x34   :  { %v1762_v30 = vld [vmem:[#allocation3 + $0x4] ss:$16 sps:$4 sm:$0xff]   ;;  %v1764_v31 = vld [vmem:[#allocation3 + $0xc] ss:$16 sps:$4 sm:$0xff]   ;;  %v1766_v32 = vld [vmem:[#allocation3] ss:$16 sps:$4 sm:$0xff]  }
  0x35   :  { %293 = vmatpush1.bf16.msra.mxu0 %v1736_v12  ;;  %334 = vmatpush1.bf16.msra.mxu1 %v1737_v13  ;;  %v1767_v33 = vld [vmem:[#allocation3 + $0x8] ss:$16 sps:$4 sm:$0xff]   ;;  %v2064_v35 = vld [vmem:[%s2106_s0] sm:$0xf]  ;;  %vm2001_vm0 = vmmov 0   ;;  %vm1476_vm1 = vcmask 7168  }
  0x36   :  { %294 = vmatprep.subr.bf16.mxu0 %v1738_v14  ;;  %335 = vmatprep.subr.bf16.mxu1 %v1740_v15  ;;  %v1770_v34 = vld [vmem:[#allocation7 + $0xac] ss:$12 sps:$4 sm:$0xff]   ;;  %v1768_v36 = vld [vmem:[#allocation7 + $0xa8] ss:$12 sps:$4 sm:$0xff]   ;;  %v1771_v37 = vld [vmem:[#allocation7 + $0xb0] ss:$12 sps:$4 sm:$0xff]  }
  0x37   :  { %v1774_v39 = vld [vmem:[#allocation7 + $0x94] ss:$12 sps:$4 sm:$0xff]   ;;  %v1772_v40 = vld [vmem:[#allocation7 + $0x90] ss:$12 sps:$4 sm:$0xff]   ;;  %v1775_v41 = vld [vmem:[#allocation7 + $0x98] ss:$12 sps:$4 sm:$0xff]  }
  0x38   :  { %v1778_v42 = vld [vmem:[#allocation7 + $0x7c] ss:$12 sps:$4 sm:$0xff]   ;;  %v1776_v43 = vld [vmem:[#allocation7 + $0x78] ss:$12 sps:$4 sm:$0xff]   ;;  %v1779_v44 = vld [vmem:[#allocation7 + $0x80] ss:$12 sps:$4 sm:$0xff]  }
  0x39   :  { %295 = vmatpush1.bf16.msra.mxu0 %v1742_v16  ;;  %336 = vmatpush1.bf16.msra.mxu1 %v1743_v17  ;;  %v1782_v45 = vld [vmem:[#allocation7 + $0x64] ss:$12 sps:$4 sm:$0xff]   ;;  %v1780_v46 = vld [vmem:[#allocation7 + $0x60] ss:$12 sps:$4 sm:$0xff]   ;;  %v1783_v47 = vld [vmem:[#allocation7 + $0x68] ss:$12 sps:$4 sm:$0xff]  }
  0x3a   :  { %296 = vmatprep.subr.bf16.mxu0 %v1744_v18  ;;  %337 = vmatprep.subr.bf16.mxu1 %v1746_v19  ;;  %v1786_v48 = vld [vmem:[#allocation7 + $0x4c] ss:$12 sps:$4 sm:$0xff]   ;;  %v1784_v49 = vld [vmem:[#allocation7 + $0x48] ss:$12 sps:$4 sm:$0xff]   ;;  %v1787_v50 = vld [vmem:[#allocation7 + $0x50] ss:$12 sps:$4 sm:$0xff]  }
  0x3b   :  { %v1790_v51 = vld [vmem:[#allocation7 + $0x34] ss:$12 sps:$4 sm:$0xff]   ;;  %v1788_v52 = vld [vmem:[#allocation7 + $0x30] ss:$12 sps:$4 sm:$0xff]   ;;  %v1791_v53 = vld [vmem:[#allocation7 + $0x38] ss:$12 sps:$4 sm:$0xff]  }
  0x3c   :  { %v1794_v54 = vld [vmem:[#allocation7 + $0x1c] ss:$12 sps:$4 sm:$0xff]   ;;  %v1792_v55 = vld [vmem:[#allocation7 + $0x18] ss:$12 sps:$4 sm:$0xff]   ;;  %v1795_v56 = vld [vmem:[#allocation7 + $0x20] ss:$12 sps:$4 sm:$0xff]  }
  0x3d   :  { %297 = vmatpush1.bf16.msra.mxu0 %v1748_v20  ;;  %338 = vmatpush1.bf16.msra.mxu1 %v1749_v21  ;;  %v1798_v57 = vld [vmem:[#allocation7 + $0x4] ss:$12 sps:$4 sm:$0xff]   ;;  %v1796_v58 = vld [vmem:[#allocation7] ss:$12 sps:$4 sm:$0xff]   ;;  %v1799_v59 = vld [vmem:[#allocation7 + $0x8] ss:$12 sps:$4 sm:$0xff]  }
  0x3e   :  { %298 = vmatprep.subr.bf16.mxu0 %v1750_v22  ;;  %339 = vmatprep.subr.bf16.mxu1 %v1752_v23  ;;  %v1802_v60 = vld [vmem:[#allocation5 + $0xac] ss:$12 sps:$4 sm:$0xff]   ;;  %v1800_v62 = vld [vmem:[#allocation5 + $0xa8] ss:$12 sps:$4 sm:$0xff]   ;;  %v1806_v2 = vld [vmem:[#allocation5 + $0x90] ss:$12 sps:$4 sm:$0xff]  }
  0x3f   :  { %v1805_v61 = vld [vmem:[#allocation5 + $0x22c] ss:$12 sps:$4 sm:$0xff]   ;;  %v1803_v63 = vld [vmem:[#allocation5 + $0x228] ss:$12 sps:$4 sm:$0xff]   ;;  %v1809_v3 = vld [vmem:[#allocation5 + $0x210] ss:$12 sps:$4 sm:$0xff]  }
  0x40   :  { %v1808_v0 = vld [vmem:[#allocation5 + $0x94] ss:$12 sps:$4 sm:$0xff]   ;;  %v1814_v4 = vld [vmem:[#allocation5 + $0x7c] ss:$12 sps:$4 sm:$0xff]   ;;  %v1812_v6 = vld [vmem:[#allocation5 + $0x78] ss:$12 sps:$4 sm:$0xff]  }
  0x41   :  { %299 = vmatpush1.bf16.msra.mxu0 %v1754_v24  ;;  %340 = vmatpush1.bf16.msra.mxu1 %v1755_v25  ;;  %v1817_v5 = vld [vmem:[#allocation5 + $0x1fc] ss:$12 sps:$4 sm:$0xff]   ;;  %v1815_v7 = vld [vmem:[#allocation5 + $0x1f8] ss:$12 sps:$4 sm:$0xff]   ;;  %v1818_v10 = vld [vmem:[#allocation5 + $0x60] ss:$12 sps:$4 sm:$0xff]  }
  0x42   :  { %300 = vmatprep.subr.bf16.mxu0 %v1756_v26  ;;  %341 = vmatprep.subr.bf16.mxu1 %v1758_v27  ;;  %v1820_v8 = vld [vmem:[#allocation5 + $0x64] ss:$12 sps:$4 sm:$0xff]   ;;  %v1821_v11 = vld [vmem:[#allocation5 + $0x1e0] ss:$12 sps:$4 sm:$0xff]   ;;  %v1824_v14 = vld [vmem:[#allocation5 + $0x48] ss:$12 sps:$4 sm:$0xff]  }
  0x43   :  { %v1823_v9 = vld [vmem:[#allocation5 + $0x1e4] ss:$12 sps:$4 sm:$0xff]   ;;  %v1826_v12 = vld [vmem:[#allocation5 + $0x4c] ss:$12 sps:$4 sm:$0xff]   ;;  %v1827_v15 = vld [vmem:[#allocation5 + $0x1c8] ss:$12 sps:$4 sm:$0xff]  }
  0x44   :  { %v1829_v13 = vld [vmem:[#allocation5 + $0x1cc] ss:$12 sps:$4 sm:$0xff]   ;;  %v1832_v16 = vld [vmem:[#allocation5 + $0x34] ss:$12 sps:$4 sm:$0xff]   ;;  %v1830_v18 = vld [vmem:[#allocation5 + $0x30] ss:$12 sps:$4 sm:$0xff]  }
  0x45   :  { %301 = vmatpush1.bf16.msra.mxu0 %v1760_v28  ;;  %342 = vmatpush1.bf16.msra.mxu1 %v1761_v29  ;;  %v1835_v17 = vld [vmem:[#allocation5 + $0x1b4] ss:$12 sps:$4 sm:$0xff]   ;;  %v1833_v19 = vld [vmem:[#allocation5 + $0x1b0] ss:$12 sps:$4 sm:$0xff]   ;;  %v1836_v22 = vld [vmem:[#allocation5 + $0x18] ss:$12 sps:$4 sm:$0xff]  }
  0x46   :  { %302 = vmatprep.subr.bf16.mxu0 %v1762_v30  ;;  %343 = vmatprep.subr.bf16.mxu1 %v1764_v31  ;;  %v1838_v20 = vld [vmem:[#allocation5 + $0x1c] ss:$12 sps:$4 sm:$0xff]   ;;  %v1839_v23 = vld [vmem:[#allocation5 + $0x198] ss:$12 sps:$4 sm:$0xff]   ;;  %v1842_v26 = vld [vmem:[#allocation5] ss:$12 sps:$4 sm:$0xff]  }
  0x47   :  { %v1841_v21 = vld [vmem:[#allocation5 + $0x19c] ss:$12 sps:$4 sm:$0xff]   ;;  %v1844_v24 = vld [vmem:[#allocation5 + $0x4] ss:$12 sps:$4 sm:$0xff]   ;;  %v1845_v27 = vld [vmem:[#allocation5 + $0x180] ss:$12 sps:$4 sm:$0xff]  }
  0x48   :  { %v1847_v25 = vld [vmem:[#allocation5 + $0x184] ss:$12 sps:$4 sm:$0xff]   ;;  %v1850_v28 = vld [vmem:[#allocation5 + $0x16c] ss:$12 sps:$4 sm:$0xff]   ;;  %v1848_v30 = vld [vmem:[#allocation5 + $0x168] ss:$12 sps:$4 sm:$0xff]  }
  0x49   :  { %303 = vmatpush1.bf16.msra.mxu0 %v1766_v32  ;;  %344 = vmatpush1.bf16.msra.mxu1 %v1767_v33  ;;  %v1853_v29 = vld [vmem:[#allocation5 + $0x2ec] ss:$12 sps:$4 sm:$0xff]   ;;  %v1851_v31 = vld [vmem:[#allocation5 + $0x2e8] ss:$12 sps:$4 sm:$0xff]  }
  0x4a   :  { %666 = vmatprep.subr.bf16.mxu0 %v1770_v34  ;;  %1690 = vmatprep.subr.bf16.mxu1 %v2000_v38  ;;  %v1856_v32 = vld [vmem:[#allocation5 + $0x154] ss:$12 sps:$4 sm:$0xff]   ;;  %v1854_v34 = vld [vmem:[#allocation5 + $0x150] ss:$12 sps:$4 sm:$0xff]  }
  0x4b   :  { %v1859_v33 = vld [vmem:[#allocation5 + $0x2d4] ss:$12 sps:$4 sm:$0xff]  }
  0x4c   :  { %321 = vmatmul.mubr.bf16.vlgmr.msra.gmra.mxu0 %v2064_v35  ;;  %362 = vmatmul.mubr.bf16.vlgmr.msra.gmra.mxu1 %v2064_v35 }
  0x4d   :  { %667 = vmatpush1.bf16.msra.mxu0 %v1768_v36  ;;  %1691 = vmatpush3.bf16.msra.mxu1 %v1771_v37  ;;  %v1862_v36 = vld [vmem:[#allocation5 + $0x13c] ss:$12 sps:$4 sm:$0xff]  }
  0x4e   :  { %668 = vmatprep.subr.bf16.mxu0 %v1774_v39  ;;  %1692 = vmatprep.subr.bf16.mxu1 %v2000_v38  ;;  %v1865_v37 = vld [vmem:[#allocation5 + $0x2bc] ss:$12 sps:$4 sm:$0xff]   ;;  %v1863_v39 = vld [vmem:[#allocation5 + $0x2b8] ss:$12 sps:$4 sm:$0xff]  }
  0x4f   :  { %698 = vmatprep.mubr.bf16.mxu0 %v1999_v1  ;;  %1706 = vmatprep.mubr.msk.bf16.mxu1 %vm2001_vm0, %v2000_v38  ;;  %v1811_v1 = vld [vmem:[#allocation5 + $0x214] ss:$12 sps:$4 sm:$0xff]  }
  0x51   :  { %669 = vmatpush1.bf16.msra.mxu0 %v1772_v40  ;;  %1693 = vmatpush3.bf16.msra.mxu1 %v1775_v41  ;;  %v1868_v40 = vld [vmem:[#allocation5 + $0x124] ss:$12 sps:$4 sm:$0xff]  }
  0x52   :  { %670 = vmatprep.subr.bf16.mxu0 %v1778_v42  ;;  %1694 = vmatprep.subr.bf16.mxu1 %v2000_v38  ;;  %v1871_v41 = vld [vmem:[#allocation5 + $0x2a4] ss:$12 sps:$4 sm:$0xff]   ;;  %v1866_v42 = vld [vmem:[#allocation5 + $0x120] ss:$12 sps:$4 sm:$0xff]  }
  0x55   :  { %671 = vmatpush1.bf16.msra.mxu0 %v1776_v43  ;;  %1695 = vmatpush3.bf16.msra.mxu1 %v1779_v44  ;;  %v1869_v43 = vld [vmem:[#allocation5 + $0x2a0] ss:$12 sps:$4 sm:$0xff]  }
  0x56   :  { %672 = vmatprep.subr.bf16.mxu0 %v1782_v45  ;;  %1696 = vmatprep.subr.bf16.mxu1 %v2000_v38  ;;  %v1874_v44 = vld [vmem:[#allocation5 + $0x10c] ss:$12 sps:$4 sm:$0xff]  }
  0x57   :  { %v1877_v45 = vld [vmem:[#allocation5 + $0x28c] ss:$12 sps:$4 sm:$0xff]  }
  0x59   :  { %673 = vmatpush1.bf16.msra.mxu0 %v1780_v46  ;;  %1697 = vmatpush3.bf16.msra.mxu1 %v1783_v47  ;;  %v1872_v46 = vld [vmem:[#allocation5 + $0x108] ss:$12 sps:$4 sm:$0xff]  }
  0x5a   :  { %674 = vmatprep.subr.bf16.mxu0 %v1786_v48  ;;  %1698 = vmatprep.subr.bf16.mxu1 %v2000_v38  ;;  %v1875_v47 = vld [vmem:[#allocation5 + $0x288] ss:$12 sps:$4 sm:$0xff]  }
  0x5b   :  { %v1880_v48 = vld [vmem:[#allocation5 + $0xf4] ss:$12 sps:$4 sm:$0xff]  }
  0x5d   :  { %675 = vmatpush1.bf16.msra.mxu0 %v1784_v49  ;;  %1699 = vmatpush3.bf16.msra.mxu1 %v1787_v50  ;;  %v1883_v49 = vld [vmem:[#allocation5 + $0x274] ss:$12 sps:$4 sm:$0xff]   ;;  %v1878_v50 = vld [vmem:[#allocation5 + $0xf0] ss:$12 sps:$4 sm:$0xff]  }
  0x5e   :  { %676 = vmatprep.subr.bf16.mxu0 %v1790_v51  ;;  %1700 = vmatprep.subr.bf16.mxu1 %v2000_v38  ;;  %v1881_v51 = vld [vmem:[#allocation5 + $0x270] ss:$12 sps:$4 sm:$0xff]  }
  0x61   :  { %677 = vmatpush1.bf16.msra.mxu0 %v1788_v52  ;;  %1701 = vmatpush3.bf16.msra.mxu1 %v1791_v53  ;;  %v1886_v52 = vld [vmem:[#allocation5 + $0xdc] ss:$12 sps:$4 sm:$0xff]  }
  0x62   :  { %678 = vmatprep.subr.bf16.mxu0 %v1794_v54  ;;  %1702 = vmatprep.subr.bf16.mxu1 %v2000_v38  ;;  %v1889_v53 = vld [vmem:[#allocation5 + $0x25c] ss:$12 sps:$4 sm:$0xff]   ;;  %v1884_v54 = vld [vmem:[#allocation5 + $0xd8] ss:$12 sps:$4 sm:$0xff]  }
  0x65   :  { %679 = vmatpush1.bf16.msra.mxu0 %v1792_v55  ;;  %1703 = vmatpush3.bf16.msra.mxu1 %v1795_v56  ;;  %v1887_v55 = vld [vmem:[#allocation5 + $0x258] ss:$12 sps:$4 sm:$0xff]  }
  0x66   :  { %680 = vmatprep.subr.bf16.mxu0 %v1798_v57  ;;  %1704 = vmatprep.subr.bf16.mxu1 %v2000_v38  ;;  %v1860_v38 = vld [vmem:[#allocation5 + $0x138] ss:$12 sps:$4 sm:$0xff]  }
  0x67   :  { %v1892_v56 = vld [vmem:[#allocation5 + $0xc4] ss:$12 sps:$4 sm:$0xff]  }
  0x68   :  { %v1895_v57 = vld [vmem:[#allocation5 + $0x244] ss:$12 sps:$4 sm:$0xff]  }
  0x69   :  { %681 = vmatpush1.bf16.msra.mxu0 %v1796_v58  ;;  %1705 = vmatpush3.bf16.msra.mxu1 %v1799_v59  ;;  %v1890_v58 = vld [vmem:[#allocation5 + $0xc0] ss:$12 sps:$4 sm:$0xff]  }
  0x6a   :  { %1259 = vmatprep.subr.bf16.mxu0 %v1802_v60  ;;  %1300 = vmatprep.subr.bf16.mxu1 %v1805_v61  ;;  %v1893_v59 = vld [vmem:[#allocation5 + $0x240] ss:$12 sps:$4 sm:$0xff]   ;;  %v1896_v60 = vld [vmem:[#allocation5 + $0x170] ss:$12 sps:$4 sm:$0xff]  }
  0x6b   :  { %v1897_v61 = vld [vmem:[#allocation5 + $0x2f0] ss:$12 sps:$4 sm:$0xff]  }
  0x6c   :  { %699 = vmatmul.mubr.bf16.vlgmr.msra.gmra.mxu0 %v2064_v35  ;;  %1707 = vmatmul.mubr.bf16.vlgmr.msra.gmra.mxu1 %v2064_v35  ;;  %v1857_v35 = vld [vmem:[#allocation5 + $0x2d0] ss:$12 sps:$4 sm:$0xff]  }
  0x6d   :  { %1260 = vmatpush1.bf16.msra.mxu0 %v1800_v62  ;;  %1301 = vmatpush1.bf16.msra.mxu1 %v1803_v63  ;;  %v108_v62 = vlaneseq }
  0x6e   :  { %1261 = vmatprep.subr.bf16.mxu0 %v1808_v0  ;;  %1302 = vmatprep.subr.bf16.mxu1 %v1811_v1 }
  0x6f   :  { %v109_v63 = vshrl.u32 %v108_v62, 7  ;;  %v1927_v62 = vld [vmem:[#allocation5 + $0x188] ss:$12 sps:$4 sm:$0xff]  }
  0x71   :  { %1262 = vmatpush1.bf16.msra.mxu0 %v1806_v2  ;;  %1303 = vmatpush1.bf16.msra.mxu1 %v1809_v3  ;;  %v2071_v0 = vsub.s32 0, %v109_v63  ;;  %v2073_v1 = vsub.s32 2, %v109_v63  ;;  %v106_v2 = vld [vmem:[%s2108_s2] sm:$0xf]  ;;  %v2078_v3 = vsub.s32 1, %v109_v63 }
  0x72   :  { %1263 = vmatprep.subr.bf16.mxu0 %v1814_v4  ;;  %1304 = vmatprep.subr.bf16.mxu1 %v1817_v5  ;;  %v122_v4 = vsub.s32 3, %v109_v63 }
  0x73   :  { %v111_v5 = vrot.slane %v106_v2, %v2071_v0 }
  0x75   :  { %1264 = vmatpush1.bf16.msra.mxu0 %v1812_v6  ;;  %1305 = vmatpush1.bf16.msra.mxu1 %v1815_v7  ;;  %v119_v6 = vrot.slane %v106_v2, %v2073_v1  ;;  %v115_v7 = vrot.slane %v106_v2, %v2078_v3 }
  0x76   :  { %1265 = vmatprep.subr.bf16.mxu0 %v1820_v8  ;;  %1306 = vmatprep.subr.bf16.mxu1 %v1823_v9  ;;  %v123_v8 = vrot.slane %v106_v2, %v122_v4 }
  0x79   :  { %1266 = vmatpush1.bf16.msra.mxu0 %v1818_v10  ;;  %1307 = vmatpush1.bf16.msra.mxu1 %v1821_v11 }
  0x7a   :  { %1267 = vmatprep.subr.bf16.mxu0 %v1826_v12  ;;  %1308 = vmatprep.subr.bf16.mxu1 %v1829_v13 }
  0x7d   :  { %1268 = vmatpush1.bf16.msra.mxu0 %v1824_v14  ;;  %1309 = vmatpush1.bf16.msra.mxu1 %v1827_v15 }
  0x7e   :  { %1269 = vmatprep.subr.bf16.mxu0 %v1832_v16  ;;  %1310 = vmatprep.subr.bf16.mxu1 %v1835_v17 }
  0x81   :  { %1270 = vmatpush1.bf16.msra.mxu0 %v1830_v18  ;;  %1311 = vmatpush1.bf16.msra.mxu1 %v1833_v19 }
  0x82   :  { %1271 = vmatprep.subr.bf16.mxu0 %v1838_v20  ;;  %1312 = vmatprep.subr.bf16.mxu1 %v1841_v21 }
  0x85   :  { %1272 = vmatpush1.bf16.msra.mxu0 %v1836_v22  ;;  %1313 = vmatpush1.bf16.msra.mxu1 %v1839_v23 }
  0x86   :  { %1273 = vmatprep.subr.bf16.mxu0 %v1844_v24  ;;  %1314 = vmatprep.subr.bf16.mxu1 %v1847_v25 }
  0x89   :  { %1274 = vmatpush1.bf16.msra.mxu0 %v1842_v26  ;;  %1315 = vmatpush1.bf16.msra.mxu1 %v1845_v27 }
  0x8a   :  { %1275 = vmatprep.subr.bf16.mxu0 %v1850_v28  ;;  %1316 = vmatprep.subr.bf16.mxu1 %v1853_v29  ;;  %v1898_v28 = vld [vmem:[#allocation5 + $0xb0] ss:$12 sps:$4 sm:$0xff]  }
  0x8b   :  { %v1899_v29 = vld [vmem:[#allocation5 + $0x230] ss:$12 sps:$4 sm:$0xff]  }
  0x8d   :  { %1276 = vmatpush2.bf16.msra.mxu0 %v1848_v30  ;;  %1317 = vmatpush2.bf16.msra.mxu1 %v1851_v31  ;;  %v1900_v31 = vld [vmem:[#allocation5 + $0x158] ss:$12 sps:$4 sm:$0xff]  }
  0x8e   :  { %1277 = vmatprep.subr.bf16.mxu0 %v1856_v32  ;;  %1318 = vmatprep.subr.bf16.mxu1 %v1859_v33  ;;  %v1901_v32 = vld [vmem:[#allocation5 + $0x2d8] ss:$12 sps:$4 sm:$0xff]  }
  0x8f   :  { %v1902_v33 = vld [vmem:[#allocation5 + $0x98] ss:$12 sps:$4 sm:$0xff]  }
  0x91   :  { %1278 = vmatpush2.bf16.msra.mxu0 %v1854_v34  ;;  %1319 = vmatpush2.bf16.msra.mxu1 %v1857_v35  ;;  %v1903_v34 = vld [vmem:[#allocation5 + $0x218] ss:$12 sps:$4 sm:$0xff]   ;;  %v1904_v35 = vld [vmem:[#allocation5 + $0x140] ss:$12 sps:$4 sm:$0xff]  }
  0x92   :  { %1279 = vmatprep.subr.bf16.mxu0 %v1862_v36  ;;  %1320 = vmatprep.subr.bf16.mxu1 %v1865_v37  ;;  %v1905_v36 = vld [vmem:[#allocation5 + $0x2c0] ss:$12 sps:$4 sm:$0xff]  }
  0x93   :  { %v1906_v37 = vld [vmem:[#allocation5 + $0x80] ss:$12 sps:$4 sm:$0xff]  }
  0x95   :  { %1280 = vmatpush2.bf16.msra.mxu0 %v1860_v38  ;;  %1321 = vmatpush2.bf16.msra.mxu1 %v1863_v39  ;;  %v1907_v38 = vld [vmem:[#allocation5 + $0x200] ss:$12 sps:$4 sm:$0xff]   ;;  %v1908_v39 = vld [vmem:[#allocation5 + $0x128] ss:$12 sps:$4 sm:$0xff]  }
  0x96   :  { %1281 = vmatprep.subr.bf16.mxu0 %v1868_v40  ;;  %1322 = vmatprep.subr.bf16.mxu1 %v1871_v41  ;;  %v1909_v40 = vld [vmem:[#allocation5 + $0x2a8] ss:$12 sps:$4 sm:$0xff]  }
  0x97   :  { %v1910_v41 = vld [vmem:[#allocation5 + $0x68] ss:$12 sps:$4 sm:$0xff]  }
  0x99   :  { %1282 = vmatpush2.bf16.msra.mxu0 %v1866_v42  ;;  %1323 = vmatpush2.bf16.msra.mxu1 %v1869_v43  ;;  %v1911_v42 = vld [vmem:[#allocation5 + $0x1e8] ss:$12 sps:$4 sm:$0xff]   ;;  %v1912_v43 = vld [vmem:[#allocation5 + $0x110] ss:$12 sps:$4 sm:$0xff]  }
  0x9a   :  { %1283 = vmatprep.subr.bf16.mxu0 %v1874_v44  ;;  %1324 = vmatprep.subr.bf16.mxu1 %v1877_v45  ;;  %v1913_v44 = vld [vmem:[#allocation5 + $0x290] ss:$12 sps:$4 sm:$0xff]  }
  0x9b   :  { %v1914_v45 = vld [vmem:[#allocation5 + $0x50] ss:$12 sps:$4 sm:$0xff]  }
  0x9d   :  { %1284 = vmatpush2.bf16.msra.mxu0 %v1872_v46  ;;  %1325 = vmatpush2.bf16.msra.mxu1 %v1875_v47  ;;  %v1915_v46 = vld [vmem:[#allocation5 + $0x1d0] ss:$12 sps:$4 sm:$0xff]   ;;  %v1916_v47 = vld [vmem:[#allocation5 + $0xf8] ss:$12 sps:$4 sm:$0xff]  }
  0x9e   :  { %1285 = vmatprep.subr.bf16.mxu0 %v1880_v48  ;;  %1326 = vmatprep.subr.bf16.mxu1 %v1883_v49  ;;  %v1917_v48 = vld [vmem:[#allocation5 + $0x278] ss:$12 sps:$4 sm:$0xff]  }
  0x9f   :  { %v1918_v49 = vld [vmem:[#allocation5 + $0x38] ss:$12 sps:$4 sm:$0xff]  }
  0xa1   :  { %1286 = vmatpush2.bf16.msra.mxu0 %v1878_v50  ;;  %1327 = vmatpush2.bf16.msra.mxu1 %v1881_v51  ;;  %v1919_v50 = vld [vmem:[#allocation5 + $0x1b8] ss:$12 sps:$4 sm:$0xff]   ;;  %v1920_v51 = vld [vmem:[#allocation5 + $0xe0] ss:$12 sps:$4 sm:$0xff]  }
  0xa2   :  { %1287 = vmatprep.subr.bf16.mxu0 %v1886_v52  ;;  %1328 = vmatprep.subr.bf16.mxu1 %v1889_v53  ;;  %v1921_v52 = vld [vmem:[#allocation5 + $0x260] ss:$12 sps:$4 sm:$0xff]  }
  0xa3   :  { %v1922_v53 = vld [vmem:[#allocation5 + $0x20] ss:$12 sps:$4 sm:$0xff]  }
  0xa5   :  { %1288 = vmatpush2.bf16.msra.mxu0 %v1884_v54  ;;  %1329 = vmatpush2.bf16.msra.mxu1 %v1887_v55  ;;  %v1923_v54 = vld [vmem:[#allocation5 + $0x1a0] ss:$12 sps:$4 sm:$0xff]   ;;  %v1924_v55 = vld [vmem:[#allocation5 + $0xc8] ss:$12 sps:$4 sm:$0xff]  }
  0xa6   :  { %1289 = vmatprep.subr.bf16.mxu0 %v1892_v56  ;;  %1330 = vmatprep.subr.bf16.mxu1 %v1895_v57  ;;  %v1925_v56 = vld [vmem:[#allocation5 + $0x248] ss:$12 sps:$4 sm:$0xff]  }
  0xa9   :  { %1290 = vmatpush2.bf16.msra.mxu0 %v1890_v58  ;;  %1331 = vmatpush2.bf16.msra.mxu1 %v1893_v59 }
  0xaa   :  { %1646 = vmatprep.subr.bf16.mxu0 %v1896_v60  ;;  %1668 = vmatprep.subr.bf16.mxu1 %v1897_v61  ;;  %v1926_v61 = vld [vmem:[#allocation5 + $0x8] ss:$12 sps:$4 sm:$0xff]  }
 0x10c   :  { %v322_v9 = vpop.f32.mrf.mxu0  ;;  %v363_v10 = vpop.f32.mrf.mxu1 }
 0x10d   :  { %v323_v11 = vadd.f32 %v322_v9, %v111_v5  ;;  %v364_v12 = vadd.f32 %v363_v10, %v119_v6 }
 0x10e   :  { %v324_v13 = vpop.f32.mrf.mxu0  ;;  %v365_v14 = vpop.f32.mrf.mxu1 }
 0x10f   :  { %v372_v15 = vmax.f32 %v364_v12, 0.0  ;;  %v325_v16 = vadd.f32 %v324_v13, %v115_v7  ;;  %v366_v17 = vadd.f32 %v365_v14, %v123_v8  ;;  %v370_v18 = vmax.f32 %v323_v11, 0.0 }
 0x110   :  { %v326_v19 = vpop.f32.mrf.mxu0  ;;  %v367_v20 = vpop.f32.mrf.mxu1 }
 0x111   :  { %v371_v21 = vmax.f32 %v325_v16, 0.0  ;;  %v373_v22 = vmax.f32 %v366_v17, 0.0  ;;  %v2083_v23 = vpack.c.bf16 %v372_v15, %v372_v15  ;;  %v2085_v30 = vpack.c.bf16 %v370_v18, %v370_v18  ;;  %v1421_v16 = vld [vmem:[%s2111_s5] sm:$0x7] }
 0x112   :  { %v327_v24 = vpop.f32.mrf.mxu0  ;;  %v368_v25 = vpop.f32.mrf.mxu1  ;;  %v1430_v18 = vrot.slane %v1421_v16, %v2078_v3  ;;  %v1426_v20 = vrot.slane %v1421_v16, %v2071_v0 }
 0x113   :  { %v375_v26 = vpack.c.bf16 %v371_v21, %v371_v21  ;;  %v377_v27 = vpack.c.bf16 %v373_v22, %v373_v22 }
 0x115   :  { %1291 = vmatprep.mubr.bf16.mxu0 %v375_v26  ;;  %1332 = vmatprep.mubr.bf16.mxu1 %v377_v27 }
 0x116   :  { %1292 = vmatmul.mubr.bf16.vlgmr.msra.gmra.mxu0 %v2085_v30  ;;  %1333 = vmatmul.mubr.bf16.vlgmr.msra.gmra.mxu1 %v2083_v23 }
 0x117   :  { %1647 = vmatpush3.bf16.msra.mxu0 %v1898_v28  ;;  %1669 = vmatpush3.bf16.msra.mxu1 %v1899_v29  ;;  %v1444_v28 = vld [vmem:[%s2112_s6] sm:$0x7] }
 0x118   :  { %1373 = vmatprep.mubr.bf16.mxu0 %v375_v26  ;;  %1413 = vmatprep.mubr.bf16.mxu1 %v377_v27 }
 0x119   :  { %1648 = vmatprep.subr.bf16.mxu0 %v1900_v31  ;;  %1670 = vmatprep.subr.bf16.mxu1 %v1901_v32  ;;  %v1453_v31 = vrot.slane %v1444_v28, %v2078_v3 }
 0x11b   :  { %1649 = vmatpush3.bf16.msra.mxu0 %v1902_v33  ;;  %1671 = vmatpush3.bf16.msra.mxu1 %v1903_v34 }
 0x11c   :  { %1650 = vmatprep.subr.bf16.mxu0 %v1904_v35  ;;  %1672 = vmatprep.subr.bf16.mxu1 %v1905_v36  ;;  %v1434_v35 = vrot.slane %v1421_v16, %v2073_v1 }
 0x11f   :  { %1651 = vmatpush3.bf16.msra.mxu0 %v1906_v37  ;;  %1673 = vmatpush3.bf16.msra.mxu1 %v1907_v38 }
 0x120   :  { %1652 = vmatprep.subr.bf16.mxu0 %v1908_v39  ;;  %1674 = vmatprep.subr.bf16.mxu1 %v1909_v40  ;;  %v1449_v40 = vrot.slane %v1444_v28, %v2071_v0 }
 0x123   :  { %1653 = vmatpush3.bf16.msra.mxu0 %v1910_v41  ;;  %1675 = vmatpush3.bf16.msra.mxu1 %v1911_v42  ;;  %v1457_v42 = vrot.slane %v1444_v28, %v2073_v1 }
 0x124   :  { %1654 = vmatprep.subr.bf16.mxu0 %v1912_v43  ;;  %1676 = vmatprep.subr.bf16.mxu1 %v1913_v44 }
 0x127   :  { %1655 = vmatpush3.bf16.msra.mxu0 %v1914_v45  ;;  %1677 = vmatpush3.bf16.msra.mxu1 %v1915_v46 }
 0x128   :  { %1656 = vmatprep.subr.bf16.mxu0 %v1916_v47  ;;  %1678 = vmatprep.subr.bf16.mxu1 %v1917_v48  ;;  %v1636_v48 = vld [vmem:[#allocation2] ss:$0 sm:$0xff] }
 0x12b   :  { %1657 = vmatpush3.bf16.msra.mxu0 %v1918_v49  ;;  %1679 = vmatpush3.bf16.msra.mxu1 %v1919_v50 }
 0x12c   :  { %1658 = vmatprep.subr.bf16.mxu0 %v1920_v51  ;;  %1680 = vmatprep.subr.bf16.mxu1 %v1921_v52  ;;  %v700_v57 = vpop.f32.mrf.mxu0  ;;  %v741_v58 = vpop.f32.mrf.mxu1 }
 0x12e   :  { %v702_v59 = vpop.f32.mrf.mxu0  ;;  %v1708_v60 = vpop.f32.mrf.mxu1 }
 0x12f   :  { %1659 = vmatpush3.bf16.msra.mxu0 %v1922_v53  ;;  %1681 = vmatpush3.bf16.msra.mxu1 %v1923_v54 }
 0x130   :  { %1660 = vmatprep.subr.bf16.mxu0 %v1924_v55  ;;  %1682 = vmatprep.subr.bf16.mxu1 %v1925_v56  ;;  %v704_v63 = vpop.f32.mrf.mxu0  ;;  %v744_v2 = vpop.f32.mrf.mxu1 }
 0x132   :  { %v705_v4 = vpop.f32.mrf.mxu0  ;;  %v1709_v5 = vpop.f32.mrf.mxu1 }
 0x133   :  { %1661 = vmatpush3.bf16.msra.mxu0 %v1926_v61  ;;  %1683 = vmatpush3.bf16.msra.mxu1 %v1927_v62 }
 0x136   :  { %1374 = vmatmul.mubr.bf16.vlgmr.msra.gmra.mxu0 %v2085_v30  ;;  %1414 = vmatmul.mubr.bf16.vlgmr.msra.gmra.mxu1 %v2083_v23 }
 0x1d6   :  { %v1293_v6 = vpop.f32.mrf.mxu0  ;;  %v1334_v7 = vpop.f32.mrf.mxu1 }
 0x1d7   :  { %v1294_v15 = vadd.f32 %v1293_v6, %v700_v57 }
 0x1d8   :  { %v1295_v8 = vpop.f32.mrf.mxu0  ;;  %v1336_v9 = vpop.f32.mrf.mxu1 }
 0x1d9   :  { %v1296_v14 = vadd.f32 %v1295_v8, %v702_v59  ;;  %v1335_v19 = vadd.f32 %v1334_v7, %v1294_v15 }
 0x1da   :  { %v1297_v10 = vpop.f32.mrf.mxu0  ;;  %v1338_v11 = vpop.f32.mrf.mxu1 }
 0x1db   :  { %v1337_v17 = vadd.f32 %v1336_v9, %v1296_v14  ;;  %v1438_v26 = vadd.f32 %v1426_v20, %v1335_v19 }
 0x1dc   :  { %v1298_v12 = vpop.f32.mrf.mxu0  ;;  %v1339_v13 = vpop.f32.mrf.mxu1 }
 0x1dd   :  { %v1439_v23 = vadd.f32 %v1430_v18, %v1337_v17  ;;  %v1441_v38 = vmax.f32 %v1438_v26, 0.0 }
 0x1df   :  { %v1442_v32 = vmax.f32 %v1439_v23, 0.0  ;;  %v1461_v45 = vmul.f32 %v1449_v40, %v1441_v38 }
 0x1e1   :  { %v1462_v43 = vmul.f32 %v1453_v31, %v1442_v32 }
 0x1e3   :  { %v1464_v47 = vadd.f32 %v1462_v43, %v1461_v45 }
 0x1f6   :  { %v1662_v21 = vpop.f32.mrf.mxu0  ;;  %v1684_v22 = vpop.f32.mrf.mxu1 }
 0x1f8   :  { %v1663_v24 = vpop.f32.mrf.mxu0  ;;  %v1685_v25 = vpop.f32.mrf.mxu1 }
 0x1f9   :  { %v1664_v27 = vadd.f32 %v1663_v24, %v1662_v21  ;;  %v1686_v34 = vadd.f32 %v1685_v25, %v1684_v22 }
 0x1fa   :  { %v1665_v29 = vpop.f32.mrf.mxu0  ;;  %v1687_v30 = vpop.f32.mrf.mxu1 }
 0x1fb   :  { %v1376_v33 = vadd.f32 %v1664_v27, %v741_v58 }
 0x1fc   :  { %v1666_v36 = vpop.f32.mrf.mxu0  ;;  %v1688_v37 = vpop.f32.mrf.mxu1 }
 0x1fd   :  { %v1416_v39 = vadd.f32 %v1686_v34, %v1376_v33 }
 0x1ff   :  { %v1440_v41 = vadd.f32 %v1434_v35, %v1416_v39 }
 0x201   :  { %v1443_v44 = vmax.f32 %v1440_v41, 0.0 }
 0x203   :  { %v1463_v46 = vmul.f32 %v1457_v42, %v1443_v44 }
 0x205   :  { %v1465_v3 = vadd.f32 %v1464_v47, %v1463_v46 }
 0x207   :  { %1466 = vadd.xlane.f32.xlu0 %v1465_v3 }
 0x290   :  { %v1467_v49 = vpop.xlane.xlu0 %1466 }
 0x291   :  { %v1475_v50 = vadd.f32 %v1636_v48, %v1467_v49 }
 0x293   :  { %1477 = vst.msk [vmem:[%s2114_s8] sm:$0xff] %vm1476_vm1, %v1475_v50 }
 0x294   :  { %1482 = vsyncpa [#allocation4], 1 }
 0x295   :  { %1483 = vsyncpa [#allocation6], 1 }

</bundles_post_ra>
